<compile_context>
chip_gen: v7x
topology: tpu7x:2x2x1
jax: 0.10.0
libtpu: 0.0.40
codegen_flags: <defaults>
</compile_context>

<pallas_src>
import functools

import jax
import jax.numpy as jnp
from jax.experimental import pallas as pl
from jax.experimental.pallas import tpu as pltpu

LANE = 128          # lane width (last dim) of a vreg
MIN_TB = 16         # batch-tile granularity: bf16 sublane packing needs 16 rows
VMEM_BUDGET = 48 << 20   # conservative usable scoped VMEM across v5e/v6e/v7x


def _round_up(n, m):
    return ((n + m - 1) // m) * m


def _pad2d(a, rows, cols):
    """Zero-pad a 2-D array up to (rows, cols)."""
    return jnp.zeros((rows, cols), a.dtype).at[: a.shape[0], : a.shape[1]].set(a)


def _mlp_kernel(*refs, n_layers, compute_dtype):
    """Fused MLP: refs = (x_ref, w1, b1, ..., wn, bn, o_ref).

    x_ref:  (TB, D0_pad)        VMEM, f32
    w_i:    (Di_pad, Di+1_pad)  VMEM, bf16, resident across grid steps
    b_i:    (1, Di+1_pad)       VMEM, f32
    o_ref:  (TB, Dn_pad)        VMEM, f32
    Hidden activations live entirely in VMEM/vregs (never touch HBM).
    """
    x_ref = refs[0]
    o_ref = refs[1 + 2 * n_layers]

    # Elementwise math (bias add, tanh) stays f32; only MXU operands are bf16.
    h = x_ref[...].astype(jnp.float32)
    for i in range(n_layers):
        w = refs[1 + 2 * i][...]
        b = refs[2 + 2 * i][...].astype(jnp.float32)
        h = jnp.dot(h.astype(compute_dtype), w,
                    preferred_element_type=jnp.float32) + b
        if i != n_layers - 1:
            h = jnp.tanh(h)          # EUP slot -> effectively free filler
    o_ref[...] = h.astype(o_ref.dtype)


def init_params(key, d_in, hidden_sizes, d_out, dtype=jnp.float32):
    """Deterministic init mirroring nn.Linear: W ~ U(-1/sqrt(fan_in), ..),
    stored pre-transposed as (d_in, d_out) for the kernel's x @ W layout."""
    d_layers = [d_in] + list(hidden_sizes) + [d_out]
    params = []
    for i in range(len(d_layers) - 1):
        fan_in, fan_out = d_layers[i], d_layers[i + 1]
        key, kw, kb = jax.random.split(key, 3)
        bound = 1.0 / jnp.sqrt(jnp.array(fan_in, dtype))
        w_torch = jax.random.uniform(kw, (fan_out, fan_in), dtype,
                                     minval=-bound, maxval=bound)
        b = jax.random.uniform(kb, (fan_out,), dtype,
                               minval=-bound, maxval=bound)
        params.append((w_torch.T, b))
    return params


def prepare_padded_params(params, weight_dtype=jnp.bfloat16):
    """One-time zero-padding of feature dims to 128 lanes; weights stored in
    bf16 for the MXU path, biases kept f32 (elementwise math stays f32).
    Note: for best MXU utilisation on v6e/v7x pick true hidden dims that are
    multiples of 256 (128 is already native on v5e); do not re-pad here."""
    padded = []
    for w, b in params:
        d_i, d_o = w.shape
        d_i_pad, d_o_pad = _round_up(d_i, LANE), _round_up(d_o, LANE)
        wp = _pad2d(w, d_i_pad, d_o_pad).astype(weight_dtype)
        bp = _pad2d(b.reshape(1, -1), 1, d_o_pad).astype(jnp.float32)
        padded.append((wp, bp))
    return padded


def feed_forward_nn(x, padded_params, d_out, batch_tile=512):
    """Fused forward pass: tanh on all but the last layer (matches the module)."""
    B, d_in = x.shape
    n_layers = len(padded_params)
    d_in_pad = padded_params[0][0].shape[0]
    d_out_pad = padded_params[-1][0].shape[1]
    compute_dtype = padded_params[0][0].dtype
    itemsize = jnp.dtype(x.dtype).itemsize

    weight_bytes = sum(int(w.size) * jnp.dtype(w.dtype).itemsize +
                       int(b.size) * jnp.dtype(b.dtype).itemsize
                       for w, b in padded_params)

    # ---- batch tile selection -------------------------------------------
    B_min = _round_up(B, MIN_TB)
    TB = min(_round_up(batch_tile, MIN_TB), B_min)
    # Guarantee >=2 grid steps when the batch allows it (v7x has 2 TensorCores;
    # "parallel" only helps with >=2 grid points).  No-op on v5e/v6e.
    if B_min // TB < 2 and B_min >= 2 * MIN_TB:
        TB = _round_up(-(-B_min // 2), MIN_TB)

    def _footprint(tb):
        # double-buffered x/out tiles + single-buffered resident weights/biases
        return weight_bytes + 2 * tb * (d_in_pad + d_out_pad) * itemsize

    while TB > MIN_TB and _footprint(TB) > VMEM_BUDGET:
        TB = max(MIN_TB, _round_up(TB // 2, MIN_TB))
    if _footprint(TB) > VMEM_BUDGET:
        # TODO(synk): K-tiled / emit_pipeline fallback for weights > VMEM budget.
        raise NotImplementedError("padded weights exceed single-call VMEM budget")

    B_pad = _round_up(B, TB)

    # Avoid the extra pad pass over x when the input is already aligned.
    x_in = x if (B_pad == B and d_in_pad == d_in) else _pad2d(x, B_pad, d_in_pad)

    kernel = functools.partial(_mlp_kernel, n_layers=n_layers,
                               compute_dtype=compute_dtype)

    in_specs = [pl.BlockSpec((TB, d_in_pad), lambda i: (i, 0))]
    flat_inputs = [x_in]
    resident = pl.Buffered(1)   # constant-index blocks: no double buffering
    for wp, bp in padded_params:
        in_specs.append(pl.BlockSpec(wp.shape, lambda i: (0, 0),
                                     pipeline_mode=resident))
        in_specs.append(pl.BlockSpec(bp.shape, lambda i: (0, 0),
                                     pipeline_mode=resident))
        flat_inputs.extend([wp, bp])

    # Advisory cost estimate so XLA schedules surrounding ops sensibly.
    dims = [d_in_pad] + [w.shape[1] for w, _ in padded_params]
    flops = 2 * B_pad * sum(dims[i] * dims[i + 1] for i in range(n_layers))
    transcendentals = B_pad * sum(dims[1:-1])
    bytes_accessed = B_pad * (d_in_pad + d_out_pad) * itemsize + weight_bytes
    cost = pl.CostEstimate(flops=flops, transcendentals=transcendentals,
                           bytes_accessed=bytes_accessed)

    vmem_limit = int(min(max(_footprint(TB) * 1.25 + (4 << 20), 32 << 20),
                         56 << 20))

    out_pad = pl.pallas_call(
        kernel,
        out_shape=jax.ShapeDtypeStruct((B_pad, d_out_pad), x.dtype),
        grid=(B_pad // TB,),
        in_specs=in_specs,
        out_specs=pl.BlockSpec((TB, d_out_pad), lambda i: (i, 0)),
        compiler_params=pltpu.CompilerParams(
            dimension_semantics=("parallel",),   # shards batch across TCs on v7x
            vmem_limit_bytes=vmem_limit),
        cost_estimate=cost,
    )(*flat_inputs)

    if B_pad == B and d_out_pad == d_out:
        return out_pad
    return out_pad[:B, :d_out]


if __name__ == "__main__":
    # Small shapes consistent with the module: batch=8, d_in=16,
    # hidden_sizes=[32, 32], d_out=8.
    d_in, hidden_sizes, d_out = 16, [32, 32], 8
    batch = 8

    key = jax.random.PRNGKey(0)
    key, kx = jax.random.split(key)
    x = jax.random.normal(kx, (batch, d_in), jnp.float32)

    params = init_params(key, d_in, hidden_sizes, d_out)
    padded_params = prepare_padded_params(params)          # bf16 weights, f32 bias

    out = feed_forward_nn(x, padded_params, d_out)
    out = jax.block_until_ready(out)

    # Pure-JAX reference using the same bf16 weight quantisation + f32 accum.
    ref = x
    for i, (w, b) in enumerate(params):
        ref = jnp.dot(ref.astype(jnp.bfloat16), w.astype(jnp.bfloat16),
                      preferred_element_type=jnp.float32) + b
        if i != len(params) - 1:
            ref = jnp.tanh(ref)

    assert out.shape == (batch, d_out)
    assert jnp.allclose(out, ref, atol=1e-2, rtol=1e-2)

    print("KERNEL_OK")
</pallas_src>

<mosaic_0001>
module attributes {stable_mosaic.version = 11 : i64} {
  func.func @_mlp_kernel(%arg0: i32, %arg1: memref<16x128xf32, #tpu.memory_space<vmem>>, %arg2: memref<128x128xbf16, #tpu.memory_space<vmem>>, %arg3: memref<1x128xf32, #tpu.memory_space<vmem>>, %arg4: memref<128x128xbf16, #tpu.memory_space<vmem>>, %arg5: memref<1x128xf32, #tpu.memory_space<vmem>>, %arg6: memref<128x128xbf16, #tpu.memory_space<vmem>>, %arg7: memref<1x128xf32, #tpu.memory_space<vmem>>, %arg8: memref<16x128xf32, #tpu.memory_space<vmem>>) attributes {dimension_semantics = [#tpu.dimension_semantics<parallel>], iteration_bounds = array<i64: 1>, scalar_prefetch = 0 : i64, scratch_operands = 0 : i64, tpu.core_type = #tpu.core_type<tc>, window_params = [{transform_indices = @transform_0, window_bounds = array<i64: 16, 128>}, {pipeline_mode = #tpu.pipeline_mode<synchronous>, transform_indices = @transform_1, window_bounds = array<i64: 128, 128>}, {pipeline_mode = #tpu.pipeline_mode<synchronous>, transform_indices = @transform_2, window_bounds = array<i64: 1, 128>}, {pipeline_mode = #tpu.pipeline_mode<synchronous>, transform_indices = @transform_3, window_bounds = array<i64: 128, 128>}, {pipeline_mode = #tpu.pipeline_mode<synchronous>, transform_indices = @transform_4, window_bounds = array<i64: 1, 128>}, {pipeline_mode = #tpu.pipeline_mode<synchronous>, transform_indices = @transform_5, window_bounds = array<i64: 128, 128>}, {pipeline_mode = #tpu.pipeline_mode<synchronous>, transform_indices = @transform_6, window_bounds = array<i64: 1, 128>}, {transform_indices = @transform_7, window_bounds = array<i64: 16, 128>}]} {
    %c0 = arith.constant 0 : index
    %c0_0 = arith.constant 0 : index
    %0 = vector.load %arg1[%c0, %c0_0] : memref<16x128xf32, #tpu.memory_space<vmem>>, vector<16x128xf32>
    %c0_1 = arith.constant 0 : index
    %c0_2 = arith.constant 0 : index
    %1 = vector.load %arg2[%c0_1, %c0_2] : memref<128x128xbf16, #tpu.memory_space<vmem>>, vector<128x128xbf16>
    %c0_3 = arith.constant 0 : index
    %c0_4 = arith.constant 0 : index
    %2 = vector.load %arg3[%c0_3, %c0_4] : memref<1x128xf32, #tpu.memory_space<vmem>>, vector<1x128xf32>
    %3 = arith.truncf %0 : vector<16x128xf32> to vector<16x128xbf16>
    %cst = arith.constant dense<0.000000e+00> : vector<16x128xf32>
    %4 = tpu.matmul %3, %1, %cst {dimension_numbers = #tpu.dot_dimension_numbers<[1], [0], [0], [1], [0, 0, 1, 1], [], []>} : vector<16x128xbf16>, vector<128x128xbf16>, vector<16x128xf32> -> vector<16x128xf32>
    %5 = vector.broadcast %2 : vector<1x128xf32> to vector<16x128xf32>
    %6 = arith.addf %4, %5 : vector<16x128xf32>
    %7 = math.tanh %6 : vector<16x128xf32>
    %c0_5 = arith.constant 0 : index
    %c0_6 = arith.constant 0 : index
    %8 = vector.load %arg4[%c0_5, %c0_6] : memref<128x128xbf16, #tpu.memory_space<vmem>>, vector<128x128xbf16>
    %c0_7 = arith.constant 0 : index
    %c0_8 = arith.constant 0 : index
    %9 = vector.load %arg5[%c0_7, %c0_8] : memref<1x128xf32, #tpu.memory_space<vmem>>, vector<1x128xf32>
    %10 = arith.truncf %7 : vector<16x128xf32> to vector<16x128xbf16>
    %cst_9 = arith.constant dense<0.000000e+00> : vector<16x128xf32>
    %11 = tpu.matmul %10, %8, %cst_9 {dimension_numbers = #tpu.dot_dimension_numbers<[1], [0], [0], [1], [0, 0, 1, 1], [], []>} : vector<16x128xbf16>, vector<128x128xbf16>, vector<16x128xf32> -> vector<16x128xf32>
    %12 = vector.broadcast %9 : vector<1x128xf32> to vector<16x128xf32>
    %13 = arith.addf %11, %12 : vector<16x128xf32>
    %14 = math.tanh %13 : vector<16x128xf32>
    %c0_10 = arith.constant 0 : index
    %c0_11 = arith.constant 0 : index
    %15 = vector.load %arg6[%c0_10, %c0_11] : memref<128x128xbf16, #tpu.memory_space<vmem>>, vector<128x128xbf16>
    %c0_12 = arith.constant 0 : index
    %c0_13 = arith.constant 0 : index
    %16 = vector.load %arg7[%c0_12, %c0_13] : memref<1x128xf32, #tpu.memory_space<vmem>>, vector<1x128xf32>
    %17 = arith.truncf %14 : vector<16x128xf32> to vector<16x128xbf16>
    %cst_14 = arith.constant dense<0.000000e+00> : vector<16x128xf32>
    %18 = tpu.matmul %17, %15, %cst_14 {dimension_numbers = #tpu.dot_dimension_numbers<[1], [0], [0], [1], [0, 0, 1, 1], [], []>} : vector<16x128xbf16>, vector<128x128xbf16>, vector<16x128xf32> -> vector<16x128xf32>
    %19 = vector.broadcast %16 : vector<1x128xf32> to vector<16x128xf32>
    %20 = arith.addf %18, %19 : vector<16x128xf32>
    %c0_15 = arith.constant 0 : index
    %c0_16 = arith.constant 0 : index
    %21 = vector.load %arg8[%c0_15, %c0_16] : memref<16x128xf32, #tpu.memory_space<vmem>>, vector<16x128xf32>
    tpu.vector_store %arg8[%c0_15, %c0_16], %20 {strides = array<i32>} : memref<16x128xf32, #tpu.memory_space<vmem>>, vector<16x128xf32>,
    return
  }
  func.func @transform_0(%arg0: i32) -> (i32, i32) {
    %c0_i32 = arith.constant 0 : i32
    %c0_i32_0 = arith.constant 0 : i32
    return %arg0, %c0_i32 : i32, i32
  }
  func.func @transform_1(%arg0: i32) -> (i32, i32) {
    %c0_i32 = arith.constant 0 : i32
    %c0_i32_0 = arith.constant 0 : i32
    %c0_i32_1 = arith.constant 0 : i32
    return %c0_i32, %c0_i32_0 : i32, i32
  }
  func.func @transform_2(%arg0: i32) -> (i32, i32) {
    %c0_i32 = arith.constant 0 : i32
    %c0_i32_0 = arith.constant 0 : i32
    %c0_i32_1 = arith.constant 0 : i32
    return %c0_i32, %c0_i32_0 : i32, i32
  }
  func.func @transform_3(%arg0: i32) -> (i32, i32) {
    %c0_i32 = arith.constant 0 : i32
    %c0_i32_0 = arith.constant 0 : i32
    %c0_i32_1 = arith.constant 0 : i32
    return %c0_i32, %c0_i32_0 : i32, i32
  }
  func.func @transform_4(%arg0: i32) -> (i32, i32) {
    %c0_i32 = arith.constant 0 : i32
    %c0_i32_0 = arith.constant 0 : i32
    %c0_i32_1 = arith.constant 0 : i32
    return %c0_i32, %c0_i32_0 : i32, i32
  }
  func.func @transform_5(%arg0: i32) -> (i32, i32) {
    %c0_i32 = arith.constant 0 : i32
    %c0_i32_0 = arith.constant 0 : i32
    %c0_i32_1 = arith.constant 0 : i32
    return %c0_i32, %c0_i32_0 : i32, i32
  }
  func.func @transform_6(%arg0: i32) -> (i32, i32) {
    %c0_i32 = arith.constant 0 : i32
    %c0_i32_0 = arith.constant 0 : i32
    %c0_i32_1 = arith.constant 0 : i32
    return %c0_i32, %c0_i32_0 : i32, i32
  }
  func.func @transform_7(%arg0: i32) -> (i32, i32) {
    %c0_i32 = arith.constant 0 : i32
    %c0_i32_0 = arith.constant 0 : i32
    return %arg0, %c0_i32 : i32, i32
  }
}

</mosaic_0001>

<bundles_post_ra>
// kernel: tpu_custom_call.1
= control target key start
LH: loop header
LB: loop body
LE: loop exit
PB: predicated region body
PF: predicated region fallthrough
CT: control target
= control target key end

     0   :  { %12 = vsyncpa [#allocation3], 0  ;;  %s896_s0 = inlined_call_operand.hbm [shape: f32[16,128], index: 0, kind: input, shape index: {}]   ;;  %s897_s1 = inlined_call_operand.hbm [shape: bf16[128,128], index: 1, kind: input, shape index: {}]   ;;  %s898_s2 = inlined_call_operand.vmem [shape: f32[1,128], index: 2, kind: input, shape index: {}]   ;;  %s899_s3 = inlined_call_operand.hbm [shape: bf16[128,128], index: 3, kind: input, shape index: {}]   ;;  %s900_s4 = inlined_call_operand.vmem [shape: f32[1,128], index: 4, kind: input, shape index: {}]   ;;  %s901_s5 = inlined_call_operand.hbm [shape: bf16[128,128], index: 5, kind: input, shape index: {}]   ;;  %s902_s6 = inlined_call_operand.vmem [shape: f32[1,128], index: 6, kind: input, shape index: {}]   ;;  %s903_s7 = inlined_call_operand.hbm [shape: f32[16,128], index: 7, kind: output, shape index: {}]  }
   0x1   :  { %13 = vsyncpa [#allocation6], 0 }
   0x2   :  { %14 = vsyncpa [#allocation9], 0 }
   0x3   :  { %15 = vsyncpa [#allocation4], 0  ;;  %s724_s24 = smov [#allocation5]   ;;  %s606_s28 = scalar_lea.hbm %s897_s1, 1024 }
   0x4   :  { %s33_s25 = sshll.u32 %s724_s24, 4  ;;  %p607_p0 = scmp.ne.s32.totalorder %s897_s1, %s606_s28  ;;  %s34_s25 = int_to_ptr.vmem [resolvable:$true] %s33_s25 }
   0x5   :  { %p610_p1 = scmp.lt.u32.totalorder %s606_s28, %s897_s1 }
   0x7   :  { %p612_p2 = pnand %p610_p1, %p607_p0 }
   0x9   :  { %615 = shalt.err (!%p612_p2)
}
   0xa   :  { %s616_s10 = scalar_lea.vmem %s34_s25, 1024  ;;  %p621_p4 = scmp.lt.s32.totalorder %s34_s25, %s34_s25 }
   0xb   :  { %p617_p3 = scmp.ne.s32.totalorder %s34_s25, %s616_s10  ;;  %p622_p5 = scmp.lt.s32.totalorder %s616_s10, %s616_s10 }
   0xd   :  { %p623_p6 = por %p622_p5, %p621_p4 }
   0xf   :  { %p624_p7 = pnand %p623_p6, %p617_p3 }
  0x11   :  { %627 = shalt.err (!%p624_p7)
}
  0x12   :  { %s725_s11 = smov 64   ;;  %s726_s12 = smov 4  }
  0x13   :  { %39 = dma.hbm_to_vmem [thread:$0]  %s897_s1, 1024, %s34_s25, [#allocation6], %s725_s11, %s725_s11, %s726_s12  }
  0x14   :  { %s727_s15 = smov [#allocation2]   ;;  %s628_s19 = scalar_lea.hbm %s896_s0, 256 }
  0x15   :  { %s21_s16 = sshll.u32 %s727_s15, 4  ;;  %p629_p8 = scmp.ne.s32.totalorder %s896_s0, %s628_s19  ;;  %s22_s16 = int_to_ptr.vmem [resolvable:$true] %s21_s16 }
  0x16   :  { %p632_p9 = scmp.lt.u32.totalorder %s628_s19, %s896_s0 }
  0x18   :  { %p634_p10 = pnand %p632_p9, %p629_p8 }
  0x1a   :  { %637 = shalt.err (!%p634_p10)
}
  0x1b   :  { %s638_s24 = scalar_lea.vmem %s22_s16, 256  ;;  %p643_p12 = scmp.lt.s32.totalorder %s22_s16, %s22_s16 }
  0x1c   :  { %p639_p11 = scmp.ne.s32.totalorder %s22_s16, %s638_s24  ;;  %p644_p13 = scmp.lt.s32.totalorder %s638_s24, %s638_s24 }
  0x1e   :  { %p645_p0 = por %p644_p13, %p643_p12 }
  0x20   :  { %p646_p1 = pnand %p645_p0, %p639_p11 }
  0x22   :  { %649 = shalt.err (!%p646_p1)
}
  0x23   :  { %s728_s1 = smov 128   ;;  %s729_s25 = smov 8  }
  0x24   :  { %27 = dma.hbm_to_vmem [thread:$0]  %s896_s0, 256, %s22_s16, [#allocation3], %s728_s1, %s728_s1, %s729_s25  }
  0x25   :  { %s730_s28 = smov [#allocation7]   ;;  %s731_s30 = smov [#allocation8]  }
  0x26   :  { %s47_s29 = sshll.u32 %s730_s28, 4  ;;  %s61_s8 = sshll.u32 %s731_s30, 4  ;;  %s48_s29 = int_to_ptr.vmem [resolvable:$true] %s47_s29  ;;  %s805_s8 = int_to_ptr.vmem [resolvable:$true] %s61_s8 }
  0x27   :  { %s650_s13 = scalar_lea.hbm %s899_s3, 1024 }
  0x28   :  { %p651_p2 = scmp.ne.s32.totalorder %s899_s3, %s650_s13  ;;  %p654_p3 = scmp.lt.u32.totalorder %s650_s13, %s899_s3 }
  0x2a   :  { %p656_p4 = pnand %p654_p3, %p651_p2 }
  0x2c   :  { %659 = shalt.err (!%p656_p4)
}
  0x2d   :  { %s660_s0 = scalar_lea.vmem %s48_s29, 1024  ;;  %p665_p6 = scmp.lt.s32.totalorder %s48_s29, %s48_s29 }
  0x2e   :  { %p661_p5 = scmp.ne.s32.totalorder %s48_s29, %s660_s0  ;;  %p666_p7 = scmp.lt.s32.totalorder %s660_s0, %s660_s0 }
  0x30   :  { %p667_p8 = por %p666_p7, %p665_p6 }
  0x32   :  { %p668_p9 = pnand %p667_p8, %p661_p5 }
  0x34   :  { %671 = shalt.err (!%p668_p9)
}
  0x35   :  { %53 = dma.hbm_to_vmem [thread:$0]  %s899_s3, 1024, %s48_s29, [#allocation6], %s725_s11, %s725_s11, %s726_s12  }
  0x36   :  { %s672_s22 = scalar_lea.hbm %s901_s5, 1024 }
  0x37   :  { %p673_p10 = scmp.ne.s32.totalorder %s901_s5, %s672_s22  ;;  %p676_p11 = scmp.lt.u32.totalorder %s672_s22, %s901_s5 }
  0x39   :  { %p678_p12 = pnand %p676_p11, %p673_p10 }
  0x3b   :  { %681 = shalt.err (!%p678_p12)
}
  0x3c   :  { %s682_s28 = scalar_lea.vmem %s805_s8, 1024  ;;  %p687_p0 = scmp.lt.s32.totalorder %s805_s8, %s805_s8 }
  0x3d   :  { %p683_p13 = scmp.ne.s32.totalorder %s805_s8, %s682_s28  ;;  %p688_p1 = scmp.lt.s32.totalorder %s682_s28, %s682_s28 }
  0x3f   :  { %p689_p2 = por %p688_p1, %p687_p0 }
  0x41   :  { %p690_p3 = pnand %p689_p2, %p683_p13 }
  0x43   :  { %693 = shalt.err (!%p690_p3)
}
  0x44   :  { %67 = dma.hbm_to_vmem [thread:$0]  %s901_s5, 1024, %s805_s8, [#allocation9], %s725_s11, %s725_s11, %s726_s12  }
  0x45   :  { %716 = dma.done.wait [#allocation3], 256  }
  0x46   :  { %717 = vsyncadd [#allocation3], 4294967040 }
  0x47   :  { %718 = dma.done.wait [#allocation6], 2048  }
  0x48   :  { %719 = vsyncadd [#allocation6], 4294965248 }
  0x49   :  { %720 = dma.done.wait [#allocation9], 1024  }
  0x4a   :  { %721 = vsyncadd [#allocation9], 4294966272  ;;  %v732_v0 = vmov 0.0   ;;  %vm733_vm0 = vmmov 0   ;;  %v574_v1 = vld [vmem:[#allocation5] sm:$0xff]   ;;  %v575_v2 = vld [vmem:[#allocation5 + $0x8] sm:$0xff]  }
  0x4b   :  { %503 = vmatprep.subr.bf16.mxu0 %v732_v0  ;;  %519 = vmatprep.mubr.msk.bf16.mxu0 %vm733_vm0, %v732_v0  ;;  %v576_v3 = vld [vmem:[#allocation5 + $0x10] sm:$0xff]   ;;  %v582_v4 = vld [vmem:[#allocation7] sm:$0xff]   ;;  %v577_v5 = vld [vmem:[#allocation5 + $0x18] sm:$0xff]   ;;  %s734_s9 = smov [#allocation10]  }
  0x4c   :  { %523 = vmatprep.subr.bf16.mxu1 %v732_v0  ;;  %539 = vmatprep.mubr.msk.bf16.mxu1 %vm733_vm0, %v732_v0  ;;  %v583_v6 = vld [vmem:[#allocation7 + $0x8] sm:$0xff]   ;;  %v578_v7 = vld [vmem:[#allocation5 + $0x20] sm:$0xff]   ;;  %v584_v8 = vld [vmem:[#allocation7 + $0x10] sm:$0xff]   ;;  %s435_s10 = sshll.u32 %s734_s9, 4  ;;  %s436_s10 = int_to_ptr.vmem [resolvable:$true] %s435_s10 }
  0x4d   :  { %504 = vmatpush3.bf16.msra.mxu0 %v574_v1  ;;  %524 = vmatpush3.bf16.msra.mxu1 %v582_v4  ;;  %v579_v9 = vld [vmem:[#allocation5 + $0x28] sm:$0xff]   ;;  %v585_v10 = vld [vmem:[#allocation7 + $0x18] sm:$0xff]   ;;  %v580_v11 = vld [vmem:[#allocation5 + $0x30] sm:$0xff]   ;;  %p699_p5 = scmp.lt.s32.totalorder %s436_s10, %s436_s10 }
  0x4e   :  { %505 = vmatprep.subr.bf16.mxu0 %v732_v0  ;;  %525 = vmatprep.subr.bf16.mxu1 %v732_v0  ;;  %v581_v12 = vld [vmem:[#allocation5 + $0x38] sm:$0xff]   ;;  %v83_v13 = vld [vmem:[#allocation2] sm:$0xff]  ;;  %v586_v16 = vld [vmem:[#allocation7 + $0x20] sm:$0xff]  }
  0x4f   :  { %v84_v14 = vld [vmem:[#allocation2 + $0x8] sm:$0xff]  ;;  %v587_v17 = vld [vmem:[#allocation7 + $0x28] sm:$0xff]   ;;  %v588_v18 = vld [vmem:[#allocation7 + $0x30] sm:$0xff]  }
  0x50   :  { %v102_v15 = vpack.c.bf16 %v84_v14, %v83_v13  ;;  %v589_v19 = vld [vmem:[#allocation7 + $0x38] sm:$0xff]   ;;  %v590_v20 = vld [vmem:[#allocation8] sm:$0xff]   ;;  %v591_v21 = vld [vmem:[#allocation8 + $0x8] sm:$0xff]  }
  0x51   :  { %506 = vmatpush3.bf16.msra.mxu0 %v575_v2  ;;  %526 = vmatpush3.bf16.msra.mxu1 %v583_v6  ;;  %v592_v22 = vld [vmem:[#allocation8 + $0x10] sm:$0xff]   ;;  %v593_v23 = vld [vmem:[#allocation8 + $0x18] sm:$0xff]   ;;  %v594_v34 = vld [vmem:[#allocation8 + $0x20] sm:$0xff]  }
  0x52   :  { %507 = vmatprep.subr.bf16.mxu0 %v732_v0  ;;  %527 = vmatprep.subr.bf16.mxu1 %v732_v0  ;;  %v449_v24 = vld [vmem:[%s898_s2] ss:$0 sm:$0xff]  ;;  %v595_v35 = vld [vmem:[#allocation8 + $0x28] sm:$0xff]   ;;  %v597_v37 = vld [vmem:[#allocation8 + $0x38] sm:$0xff]  }
  0x53   :  { %v596_v36 = vld [vmem:[#allocation8 + $0x30] sm:$0xff]  }
  0x54   :  { %v458_v38 = vld [vmem:[%s900_s4] ss:$0 sm:$0xff]  ;;  %s694_s4 = scalar_lea.vmem %s436_s10, 256 }
  0x55   :  { %508 = vmatpush3.bf16.msra.mxu0 %v576_v3  ;;  %528 = vmatpush3.bf16.msra.mxu1 %v584_v8  ;;  %v467_v48 = vld [vmem:[%s902_s6] ss:$0 sm:$0xff]  ;;  %p695_p4 = scmp.ne.s32.totalorder %s436_s10, %s694_s4  ;;  %p700_p6 = scmp.lt.s32.totalorder %s694_s4, %s694_s4 }
  0x56   :  { %509 = vmatprep.subr.bf16.mxu0 %v732_v0  ;;  %529 = vmatprep.subr.bf16.mxu1 %v732_v0 }
  0x57   :  { %p701_p7 = por %p700_p6, %p699_p5 }
  0x59   :  { %510 = vmatpush3.bf16.msra.mxu0 %v577_v5  ;;  %530 = vmatpush3.bf16.msra.mxu1 %v585_v10  ;;  %p702_p8 = pnand %p701_p7, %p695_p4 }
  0x5a   :  { %511 = vmatprep.subr.bf16.mxu0 %v732_v0  ;;  %531 = vmatprep.subr.bf16.mxu1 %v732_v0 }
  0x5d   :  { %512 = vmatpush3.bf16.msra.mxu0 %v578_v7  ;;  %532 = vmatpush3.bf16.msra.mxu1 %v586_v16 }
  0x5e   :  { %513 = vmatprep.subr.bf16.mxu0 %v732_v0  ;;  %533 = vmatprep.subr.bf16.mxu1 %v732_v0 }
  0x61   :  { %514 = vmatpush3.bf16.msra.mxu0 %v579_v9  ;;  %534 = vmatpush3.bf16.msra.mxu1 %v587_v17 }
  0x62   :  { %515 = vmatprep.subr.bf16.mxu0 %v732_v0  ;;  %535 = vmatprep.subr.bf16.mxu1 %v732_v0 }
  0x65   :  { %516 = vmatpush3.bf16.msra.mxu0 %v580_v11  ;;  %536 = vmatpush3.bf16.msra.mxu1 %v588_v18 }
  0x66   :  { %517 = vmatprep.subr.bf16.mxu0 %v732_v0  ;;  %537 = vmatprep.subr.bf16.mxu1 %v732_v0 }
  0x69   :  { %518 = vmatpush3.bf16.msra.mxu0 %v581_v12  ;;  %538 = vmatpush3.bf16.msra.mxu1 %v589_v19 }
  0x6a   :  { %543 = vmatprep.subr.bf16.mxu0 %v732_v0 }
  0x6c   :  { %520 = vmatmul.mubr.bf16.vlgmr.msra.gmra.mrb[0].mxu0 %v102_v15 }
  0x6d   :  { %559 = vmatprep.mubr.msk.bf16.mxu0 %vm733_vm0, %v732_v0  ;;  %544 = vmatpush3.bf16.msra.mxu0 %v590_v20 }
  0x6e   :  { %545 = vmatprep.subr.bf16.mxu0 %v732_v0 }
  0x71   :  { %546 = vmatpush3.bf16.msra.mxu0 %v591_v21 }
  0x72   :  { %547 = vmatprep.subr.bf16.mxu0 %v732_v0 }
  0x75   :  { %548 = vmatpush3.bf16.msra.mxu0 %v592_v22 }
  0x76   :  { %549 = vmatprep.subr.bf16.mxu0 %v732_v0 }
  0x79   :  { %550 = vmatpush3.bf16.msra.mxu0 %v593_v23 }
  0x7a   :  { %551 = vmatprep.subr.bf16.mxu0 %v732_v0 }
  0x7d   :  { %552 = vmatpush3.bf16.msra.mxu0 %v594_v34 }
  0x7e   :  { %553 = vmatprep.subr.bf16.mxu0 %v732_v0 }
  0x81   :  { %554 = vmatpush3.bf16.msra.mxu0 %v595_v35 }
  0x82   :  { %555 = vmatprep.subr.bf16.mxu0 %v732_v0 }
  0x85   :  { %556 = vmatpush3.bf16.msra.mxu0 %v596_v36 }
  0x86   :  { %557 = vmatprep.subr.bf16.mxu0 %v732_v0 }
  0x89   :  { %558 = vmatpush3.bf16.msra.mxu0 %v597_v37 }
 0x13f   :  { %v191_v25 = vpop.f32.mrb[0].mxu0 }
 0x140   :  { %v192_v26 = vadd.f32 %v449_v24, %v191_v25  ;;  %v521_v27 = vpop.f32.mrb[1].mxu0 }
 0x141   :  { %v194_v28 = vpop.f32.mrb[2].mxu0 }
 0x142   :  { %v195_v29 = vadd.f32 %v449_v24, %v194_v28  ;;  %v522_v30 = vpop.f32.mrb[3].mxu0  ;;  %598 = vtanh.f32 %v192_v26 }
 0x144   :  { %600 = vtanh.f32 %v195_v29 }
 0x14c   :  { %v599_v31 = vpop.eup %598 }
 0x14e   :  { %v601_v32 = vpop.eup %600 }
 0x14f   :  { %v217_v33 = vpack.c.bf16 %v601_v32, %v599_v31 }
 0x151   :  { %540 = vmatmul.mubr.bf16.vlgmr.msra.gmra.mrb[0].mxu1 %v217_v33 }
 0x224   :  { %v306_v39 = vpop.f32.mrb[0].mxu1 }
 0x225   :  { %v307_v40 = vadd.f32 %v458_v38, %v306_v39  ;;  %v541_v41 = vpop.f32.mrb[1].mxu1 }
 0x226   :  { %v309_v42 = vpop.f32.mrb[2].mxu1 }
 0x227   :  { %v310_v43 = vadd.f32 %v458_v38, %v309_v42  ;;  %v542_v44 = vpop.f32.mrb[3].mxu1  ;;  %602 = vtanh.f32 %v307_v40 }
 0x229   :  { %604 = vtanh.f32 %v310_v43 }
 0x231   :  { %v603_v45 = vpop.eup %602 }
 0x233   :  { %v605_v46 = vpop.eup %604 }
 0x234   :  { %v332_v47 = vpack.c.bf16 %v605_v46, %v603_v45 }
 0x236   :  { %560 = vmatmul.mubr.bf16.vlgmr.msra.gmra.mrb[4].mxu0 %v332_v47 }
 0x309   :  { %v421_v49 = vpop.f32.mrb[4].mxu0 }
 0x30a   :  { %v422_v50 = vadd.f32 %v467_v48, %v421_v49  ;;  %v561_v51 = vpop.f32.mrb[5].mxu0 }
 0x30b   :  { %v424_v52 = vpop.f32.mrb[6].mxu0 }
 0x30c   :  { %428 = vst [vmem:[#allocation10] sm:$0xff] %v422_v50  ;;  %v425_v53 = vadd.f32 %v467_v48, %v424_v52  ;;  %v562_v54 = vpop.f32.mrb[7].mxu0 }
 0x30e   :  { %429 = vst [vmem:[#allocation10 + $0x8] sm:$0xff] %v425_v53 }
 0x30f   :  { %705 = shalt.err (!%p702_p8)
}
 0x310   :  { %s706_s14 = scalar_lea.hbm %s903_s7, 256 }
 0x311   :  { %p707_p9 = scmp.ne.s32.totalorder %s903_s7, %s706_s14  ;;  %p710_p10 = scmp.lt.u32.totalorder %s706_s14, %s903_s7 }
 0x313   :  { %p712_p11 = pnand %p710_p10, %p707_p9 }
 0x315   :  { %715 = shalt.err (!%p712_p11)
}
 0x316   :  { %441 = dma.vmem_to_hbm [thread:$0]  %s436_s10, 256, %s903_s7, [#allocation4], %s728_s1, %s728_s1, %s729_s25  }
 0x317   :  { %722 = dma.done.wait [#allocation4], 256  }
 0x318   :  { %723 = vsyncadd [#allocation4], 4294967040 }
 0x319   :  { %445 = vsyncpa [#allocation3], 1 }
 0x31a   :  { %446 = vsyncpa [#allocation6], 1 }
 0x31b   :  { %447 = vsyncpa [#allocation9], 1 }
 0x31c   :  { %448 = vsyncpa [#allocation4], 1 }

</bundles_post_ra>
